<compile_context>
chip_gen: v7x
topology: tpu7x:2x2x1
jax: 0.10.0
libtpu: 0.0.40
codegen_flags: <defaults>
</compile_context>

<pallas_src>
import numpy as np
import jax
import jax.numpy as jnp
from jax.experimental import pallas as pl
from jax.experimental.pallas import tpu as pltpu


def _round_up(x, m):
    return ((x + m - 1) // m) * m


# ----------------------------- Pallas kernels ------------------------------

def _stft_roundtrip_kernel(frames_ref, fwd_ref, inv_ref, contrib_ref, reim_ref):
    """Fused STFT -> iSTFT for a row tile of frame pairs.

    frames_ref : (TILE, 2L)  bf16   two consecutive frames per row
    fwd_ref    : (2L, 2W)    bf16   block-diagonal packed forward basis
    inv_ref    : (2W, 2L)    f32    block-diagonal packed inverse basis
    contrib_ref: (TILE, 2L)  f32    per-frame tap contributions (lane-dense)
    reim_ref   : (TILE, 2W)  bf16   packed re|im spectrum (attributes / transform only)
    """
    reim = jnp.dot(frames_ref[...], fwd_ref[...], preferred_element_type=jnp.float32)
    reim_ref[...] = reim.astype(reim_ref.dtype)
    contrib_ref[...] = jnp.dot(reim, inv_ref[...], preferred_element_type=jnp.float32)


def _stft_forward_kernel(frames_ref, fwd_ref, reim_ref):
    """Forward-only: frame pairs (TILE, 2L) @ packed basis (2L, 2W) -> packed re|im."""
    reim_ref[...] = jnp.dot(frames_ref[...], fwd_ref[...],
                            preferred_element_type=jnp.float32).astype(reim_ref.dtype)


def _istft_kernel(spec_ref, inv_ref, out_ref):
    """Inverse-only: packed pair spectra (TILE, 2W) @ inverse basis (2W, 2L) -> taps."""
    out_ref[...] = jnp.dot(spec_ref[...], inv_ref[...],
                           preferred_element_type=jnp.float32)


# ------------------------------ STFT module --------------------------------

class STFTPallas:
    def __init__(self, filter_length=64, hop_length=32, win_length=None, window="hann"):
        assert window == "hann", "only hann window implemented in-script"
        self.filter_length = L = filter_length
        self.hop_length = H = hop_length
        self.win_length = win_length if win_length else filter_length
        assert filter_length >= self.win_length
        assert filter_length == 2 * hop_length, "module is restricted to 50% overlap"
        assert filter_length % 64 == 0, "lane packing assumes filter_length % 64 == 0"
        self.pad_amount = L // 2
        self.cutoff = C = L // 2 + 1
        scale = L / H

        # Fourier basis (real rows stacked over imag rows), as in the PyTorch module.
        fourier_basis = np.fft.fft(np.eye(L))
        fourier_basis = np.vstack(
            [np.real(fourier_basis[:C, :]), np.imag(fourier_basis[:C, :])]
        )  # (2C, L)

        # hann window, fftbins=True (periodic), pad_center'ed to filter_length.
        n = np.arange(self.win_length)
        win = 0.5 - 0.5 * np.cos(2.0 * np.pi * n / self.win_length)
        lpad = (L - self.win_length) // 2
        fft_window = np.zeros(L, dtype=np.float64)
        fft_window[lpad:lpad + self.win_length] = win

        forward_basis = (fourier_basis * fft_window[None, :]).astype(np.float32)   # (2C, L)
        inverse_basis = (np.linalg.pinv(scale * fourier_basis).T
                         * fft_window[None, :]).astype(np.float32)                 # (2C, L)

        # Unfused f32 bases kept only for the pure-JAX reference check.
        self.w_real_T = jnp.asarray(forward_basis[:C].T)    # (L, C)
        self.w_imag_T = jnp.asarray(forward_basis[C:].T)    # (L, C)
        self.inv_real = jnp.asarray(inverse_basis[:C])       # (C, L)
        self.inv_imag = jnp.asarray(inverse_basis[C:])       # (C, L)

        # Per-frame lane layout: lanes [0:C] = real, lanes [HALF:HALF+C] = imag, rest zero.
        self.half = HALF = _round_up(C, 64)     # per-part lane slot (multiple of 64)
        self.specw = W = 2 * HALF               # packed per-frame spectrum width (>=128)

        fwd1 = np.zeros((L, W), np.float32)
        fwd1[:, :C] = forward_basis[:C].T
        fwd1[:, HALF:HALF + C] = forward_basis[C:].T

        # Two frames per kernel row: block-diagonal forward basis (2L, 2W).
        fwd2 = np.zeros((2 * L, 2 * W), np.float32)
        fwd2[:L, :W] = fwd1
        fwd2[L:, W:] = fwd1
        self.fwd2_basis = jnp.asarray(fwd2, dtype=jnp.bfloat16)

        # Block-diagonal inverse basis (2W, 2L): lanes [0:L] even-frame taps, [L:2L] odd.
        inv1 = np.zeros((W, L), np.float32)
        inv1[0:C, :] = inverse_basis[:C]
        inv1[HALF:HALF + C, :] = inverse_basis[C:]
        inv2 = np.zeros((2 * W, 2 * L), np.float32)
        inv2[:W, :L] = inv1
        inv2[W:, L:] = inv1
        self.inv2_basis = jnp.asarray(inv2)     # f32: tiny, VMEM-resident

        # NOTE: num_samples / magnitude / phase are Python-side state (matches the
        # original torch module's behavior); fragile if traced separately across shapes.
        self.num_samples = None

    # --------------------------- framing (XLA glue) --------------------------
    def _frame_pairs(self, x):
        """Reflect-pad, frame, pack two frames per row, pad rows to the row tile."""
        B, T = x.shape
        self.num_samples = T
        L, H = self.filter_length, self.hop_length
        pad = self.pad_amount

        xp = jnp.pad(x, ((0, 0), (pad, pad)), mode="reflect")
        n_frames = (xp.shape[-1] - L) // H + 1

        # TODO(synk): because L == 2H a row tile of frames is one contiguous sample span;
        # in-kernel framing via manual DMA (memory_space=pl.ANY + make_async_copy) would
        # avoid materializing this 2x-duplicated frame matrix in HBM.
        idx = np.arange(n_frames)[:, None] * H + np.arange(L)[None, :]
        frames2d = xp[:, idx].reshape(B * n_frames, L).astype(jnp.bfloat16)

        R = B * n_frames
        R2 = -(-R // 2)                               # pair rows (two frames per row)
        tile = min(2048, _round_up(R2, 16))           # big mem-bound tiles, bf16-friendly
        r2_pad = _round_up(R2, tile)
        r_pad = 2 * r2_pad
        if r_pad != R:
            frames2d = jnp.pad(frames2d, ((0, r_pad - R), (0, 0)))
        frames2 = frames2d.reshape(r2_pad, 2 * L)     # free row-major reshape
        return frames2, B, n_frames, R, r2_pad, tile

    # --------------------------- fused round trip ---------------------------
    def _roundtrip_core(self, x):
        frames2, B, nf, R, r2_pad, tile = self._frame_pairs(x)
        L, W = self.filter_length, self.specw

        contrib2, reim2 = pl.pallas_call(
            _stft_roundtrip_kernel,
            grid=(r2_pad // tile,),
            in_specs=[
                pl.BlockSpec((tile, 2 * L), lambda i: (i, 0)),
                pl.BlockSpec((2 * L, 2 * W), lambda i: (0, 0)),   # bases stay VMEM-resident
                pl.BlockSpec((2 * W, 2 * L), lambda i: (0, 0)),
            ],
            out_specs=(
                pl.BlockSpec((tile, 2 * L), lambda i: (i, 0)),
                pl.BlockSpec((tile, 2 * W), lambda i: (i, 0)),
            ),
            out_shape=(
                jax.ShapeDtypeStruct((r2_pad, 2 * L), jnp.float32),
                jax.ShapeDtypeStruct((r2_pad, 2 * W), jnp.bfloat16),
            ),
            compiler_params=pltpu.CompilerParams(dimension_semantics=("parallel",)),
        )(frames2, self.fwd2_basis, self.inv2_basis)

        reim = reim2.reshape(-1, W)[:R]               # (R, W) packed re|im (bf16)
        return contrib2, reim, B, nf, R

    # --------------------------- overlap-add (glue) --------------------------
    def _overlap_add(self, contrib_rows, B, nf, R):
        """contrib_rows: (>=R, L) per-frame taps -> conv_transpose1d-style OLA (L == 2H)."""
        L, H = self.filter_length, self.hop_length
        contrib = contrib_rows[:R].reshape(B, nf, 2, H)
        first = contrib[:, :, 0, :].reshape(B, nf * H)
        second = contrib[:, :, 1, :].reshape(B, nf * H)
        full = jnp.pad(first, ((0, 0), (0, H))) + jnp.pad(second, ((0, 0), (H, 0)))
        out = full[:, self.pad_amount:]
        return out[:, :self.num_samples]

    def _mag_phase_from_reim(self, reim, B, nf):
        C, HALF = self.cutoff, self.half
        re = reim[:, :C].astype(jnp.float32)
        im = reim[:, HALF:HALF + C].astype(jnp.float32)
        # TODO(synk): sqrt/atan2 kept in XLA glue (attribute path only; not on the
        # reconstruction hot path).
        magnitude = jnp.sqrt(re * re + im * im).reshape(B, nf, C).transpose(0, 2, 1)
        phase = jnp.arctan2(im, re).reshape(B, nf, C).transpose(0, 2, 1)
        return magnitude, phase

    # ------------------------------ public API ------------------------------
    def transform(self, input_data):
        frames2, B, nf, R, r2_pad, tile = self._frame_pairs(input_data)
        L, W = self.filter_length, self.specw
        reim2 = pl.pallas_call(
            _stft_forward_kernel,
            grid=(r2_pad // tile,),
            in_specs=[
                pl.BlockSpec((tile, 2 * L), lambda i: (i, 0)),
                pl.BlockSpec((2 * L, 2 * W), lambda i: (0, 0)),
            ],
            out_specs=pl.BlockSpec((tile, 2 * W), lambda i: (i, 0)),
            out_shape=jax.ShapeDtypeStruct((r2_pad, 2 * W), jnp.bfloat16),
            compiler_params=pltpu.CompilerParams(dimension_semantics=("parallel",)),
        )(frames2, self.fwd2_basis)
        reim = reim2.reshape(-1, W)[:R]
        return self._mag_phase_from_reim(reim, B, nf)

    def inverse(self, magnitude, phase):
        B, C, nf = magnitude.shape
        HALF, W, L = self.half, self.specw, self.filter_length
        mag_r = magnitude.transpose(0, 2, 1).reshape(B * nf, C)
        ph_r = phase.transpose(0, 2, 1).reshape(B * nf, C)
        # TODO(synk): cos/sin kept in XLA glue for the public (magnitude, phase) API;
        # forward() bypasses them entirely via the fused re/im round trip.
        rr = mag_r * jnp.cos(ph_r)
        ii = mag_r * jnp.sin(ph_r)
        spec = jnp.zeros((B * nf, W), jnp.float32)
        spec = spec.at[:, :C].set(rr).at[:, HALF:HALF + C].set(ii)

        R = B * nf
        R2 = -(-R // 2)
        tile = min(2048, _round_up(R2, 16))
        r2_pad = _round_up(R2, tile)
        r_pad = 2 * r2_pad
        if r_pad != R:
            spec = jnp.pad(spec, ((0, r_pad - R), (0, 0)))
        spec2 = spec.reshape(r2_pad, 2 * W)           # two frames per row (free reshape)

        contrib2 = pl.pallas_call(
            _istft_kernel,
            grid=(r2_pad // tile,),
            in_specs=[
                pl.BlockSpec((tile, 2 * W), lambda i: (i, 0)),
                pl.BlockSpec((2 * W, 2 * L), lambda i: (0, 0)),
            ],
            out_specs=pl.BlockSpec((tile, 2 * L), lambda i: (i, 0)),
            out_shape=jax.ShapeDtypeStruct((r2_pad, 2 * L), jnp.float32),
            compiler_params=pltpu.CompilerParams(dimension_semantics=("parallel",)),
        )(spec2, self.inv2_basis)

        return self._overlap_add(contrib2.reshape(-1, L), B, nf, R)

    def forward(self, input_data):
        contrib2, reim, B, nf, R = self._roundtrip_core(input_data)
        # Expose magnitude/phase like the original module (attribute side effect only);
        # the reconstruction itself never re-reads the spectrum from HBM.
        self.magnitude, self.phase = self._mag_phase_from_reim(reim, B, nf)
        return self._overlap_add(contrib2.reshape(-1, self.filter_length), B, nf, R)

    __call__ = forward


# ---------------------------- pure-JAX reference ----------------------------

def _reference_forward(stft, x):
    B, T = x.shape
    pad, L, H, C = stft.pad_amount, stft.filter_length, stft.hop_length, stft.cutoff
    xp = jnp.pad(x, ((0, 0), (pad, pad)), mode="reflect")
    n_frames = (xp.shape[-1] - L) // H + 1
    idx = np.arange(n_frames)[:, None] * H + np.arange(L)[None, :]
    frames = xp[:, idx].reshape(B * n_frames, L)
    re = frames @ stft.w_real_T
    im = frames @ stft.w_imag_T
    mag = jnp.sqrt(re * re + im * im)
    ph = jnp.arctan2(im, re)
    contrib = (mag * jnp.cos(ph)) @ stft.inv_real + (mag * jnp.sin(ph)) @ stft.inv_imag
    contrib = contrib.reshape(B, n_frames, 2, H)
    first = contrib[:, :, 0, :].reshape(B, n_frames * H)
    second = contrib[:, :, 1, :].reshape(B, n_frames * H)
    full = jnp.pad(first, ((0, 0), (0, H))) + jnp.pad(second, ((0, 0), (H, 0)))
    return full[:, pad:pad + T]


# ---------------------------------- main ------------------------------------

if __name__ == "__main__":
    key = jax.random.PRNGKey(0)
    batch, num_samples = 2, 256
    x = jax.random.normal(key, (batch, num_samples), dtype=jnp.float32)

    stft = STFTPallas(filter_length=64, hop_length=32, window="hann")

    # Fused forward round trip (single pallas_call on the hot path).
    recon = jax.block_until_ready(stft(x))
    assert recon.shape == (batch, num_samples), recon.shape
    assert bool(jnp.all(jnp.isfinite(recon)))

    # Public transform -> inverse path (forward-only + inverse-only kernels).
    magnitude, phase = stft.transform(x)
    assert magnitude.shape == (batch, stft.cutoff, num_samples // stft.hop_length + 1)
    recon2 = jax.block_until_ready(stft.inverse(magnitude, phase))

    ref = jax.block_until_ready(_reference_forward(stft, x))
    np.testing.assert_allclose(np.asarray(recon), np.asarray(ref), atol=2e-2, rtol=2e-2)
    np.testing.assert_allclose(np.asarray(recon2), np.asarray(ref), atol=2e-2, rtol=2e-2)

    print("KERNEL_OK")
</pallas_src>

<mosaic_0001>
module attributes {stable_mosaic.version = 11 : i64} {
  func.func @_stft_roundtrip_kernel(%arg0: i32, %arg1: memref<16x128xbf16, #tpu.memory_space<vmem>>, %arg2: memref<128x256xbf16, #tpu.memory_space<vmem>>, %arg3: memref<256x128xf32, #tpu.memory_space<vmem>>, %arg4: memref<16x128xf32, #tpu.memory_space<vmem>>, %arg5: memref<16x256xbf16, #tpu.memory_space<vmem>>) attributes {dimension_semantics = [#tpu.dimension_semantics<parallel>], iteration_bounds = array<i64: 1>, scalar_prefetch = 0 : i64, scratch_operands = 0 : i64, tpu.core_type = #tpu.core_type<tc>, window_params = [{transform_indices = @transform_0, window_bounds = array<i64: 16, 128>}, {pipeline_mode = #tpu.pipeline_mode<synchronous>, transform_indices = @transform_1, window_bounds = array<i64: 128, 256>}, {pipeline_mode = #tpu.pipeline_mode<synchronous>, transform_indices = @transform_2, window_bounds = array<i64: 256, 128>}, {transform_indices = @transform_3, window_bounds = array<i64: 16, 128>}, {transform_indices = @transform_4, window_bounds = array<i64: 16, 256>}]} {
    %c0 = arith.constant 0 : index
    %c0_0 = arith.constant 0 : index
    %0 = vector.load %arg1[%c0, %c0_0] : memref<16x128xbf16, #tpu.memory_space<vmem>>, vector<16x128xbf16>
    %c0_1 = arith.constant 0 : index
    %c0_2 = arith.constant 0 : index
    %1 = vector.load %arg2[%c0_1, %c0_2] : memref<128x256xbf16, #tpu.memory_space<vmem>>, vector<128x256xbf16>
    %cst = arith.constant dense<0.000000e+00> : vector<16x256xf32>
    %2 = tpu.matmul %0, %1, %cst {dimension_numbers = #tpu.dot_dimension_numbers<[1], [0], [0], [1], [0, 0, 1, 1], [], []>} : vector<16x128xbf16>, vector<128x256xbf16>, vector<16x256xf32> -> vector<16x256xf32>
    %3 = arith.truncf %2 : vector<16x256xf32> to vector<16x256xbf16>
    %c0_3 = arith.constant 0 : index
    %c0_4 = arith.constant 0 : index
    %4 = vector.load %arg5[%c0_3, %c0_4] : memref<16x256xbf16, #tpu.memory_space<vmem>>, vector<16x256xbf16>
    tpu.vector_store %arg5[%c0_3, %c0_4], %3 {strides = array<i32>} : memref<16x256xbf16, #tpu.memory_space<vmem>>, vector<16x256xbf16>,
    %c0_5 = arith.constant 0 : index
    %c0_6 = arith.constant 0 : index
    %5 = vector.load %arg3[%c0_5, %c0_6] : memref<256x128xf32, #tpu.memory_space<vmem>>, vector<256x128xf32>
    %cst_7 = arith.constant dense<0.000000e+00> : vector<16x128xf32>
    %6 = tpu.matmul %2, %5, %cst_7 {dimension_numbers = #tpu.dot_dimension_numbers<[1], [0], [0], [1], [0, 0, 1, 1], [], []>} : vector<16x256xf32>, vector<256x128xf32>, vector<16x128xf32> -> vector<16x128xf32>
    %c0_8 = arith.constant 0 : index
    %c0_9 = arith.constant 0 : index
    %7 = vector.load %arg4[%c0_8, %c0_9] : memref<16x128xf32, #tpu.memory_space<vmem>>, vector<16x128xf32>
    tpu.vector_store %arg4[%c0_8, %c0_9], %6 {strides = array<i32>} : memref<16x128xf32, #tpu.memory_space<vmem>>, vector<16x128xf32>,
    return
  }
  func.func @transform_0(%arg0: i32) -> (i32, i32) {
    %c0_i32 = arith.constant 0 : i32
    %c0_i32_0 = arith.constant 0 : i32
    return %arg0, %c0_i32 : i32, i32
  }
  func.func @transform_1(%arg0: i32) -> (i32, i32) {
    %c0_i32 = arith.constant 0 : i32
    %c0_i32_0 = arith.constant 0 : i32
    %c0_i32_1 = arith.constant 0 : i32
    return %c0_i32, %c0_i32_0 : i32, i32
  }
  func.func @transform_2(%arg0: i32) -> (i32, i32) {
    %c0_i32 = arith.constant 0 : i32
    %c0_i32_0 = arith.constant 0 : i32
    %c0_i32_1 = arith.constant 0 : i32
    return %c0_i32, %c0_i32_0 : i32, i32
  }
  func.func @transform_3(%arg0: i32) -> (i32, i32) {
    %c0_i32 = arith.constant 0 : i32
    %c0_i32_0 = arith.constant 0 : i32
    return %arg0, %c0_i32 : i32, i32
  }
  func.func @transform_4(%arg0: i32) -> (i32, i32) {
    %c0_i32 = arith.constant 0 : i32
    %c0_i32_0 = arith.constant 0 : i32
    return %arg0, %c0_i32 : i32, i32
  }
}

</mosaic_0001>

<bundles_post_ra>
// kernel: tpu_custom_call.1
= control target key start
LH: loop header
LB: loop body
LE: loop exit
PB: predicated region body
PF: predicated region fallthrough
CT: control target
= control target key end

     0   :  { %10 = vsyncpa [#allocation3], 0  ;;  %s715_s0 = inlined_call_operand.hbm [shape: bf16[16,128], index: 0, kind: input, shape index: {}]   ;;  %s716_s1 = inlined_call_operand.hbm [shape: bf16[128,256], index: 1, kind: input, shape index: {}]   ;;  %s717_s2 = inlined_call_operand.hbm [shape: f32[256,128], index: 2, kind: input, shape index: {}]   ;;  %s718_s3 = inlined_call_operand.hbm [shape: f32[16,128], index: 3, kind: output, shape index: {0}]   ;;  %s719_s4 = inlined_call_operand.hbm [shape: bf16[16,256], index: 4, kind: output, shape index: {1}]  }
   0x1   :  { %11 = vsyncpa [#allocation6], 0 }
   0x2   :  { %12 = vsyncpa [#allocation4], 0 }
   0x3   :  { %13 = vsyncpa [#allocation10], 0  ;;  %s608_s15 = smov [#allocation5]   ;;  %s490_s19 = scalar_lea.hbm %s716_s1, 2048 }
   0x4   :  { %s31_s16 = sshll.u32 %s608_s15, 4  ;;  %p491_p0 = scmp.ne.s32.totalorder %s716_s1, %s490_s19  ;;  %s32_s16 = int_to_ptr.vmem [resolvable:$true] %s31_s16 }
   0x5   :  { %p494_p1 = scmp.lt.u32.totalorder %s490_s19, %s716_s1 }
   0x7   :  { %p496_p2 = pnand %p494_p1, %p491_p0 }
   0x9   :  { %499 = shalt.err (!%p496_p2)
}
   0xa   :  { %s500_s24 = scalar_lea.vmem %s32_s16, 2048  ;;  %p505_p4 = scmp.lt.s32.totalorder %s32_s16, %s32_s16 }
   0xb   :  { %p501_p3 = scmp.ne.s32.totalorder %s32_s16, %s500_s24  ;;  %p506_p5 = scmp.lt.s32.totalorder %s500_s24, %s500_s24 }
   0xd   :  { %p507_p6 = por %p506_p5, %p505_p4 }
   0xf   :  { %p508_p7 = pnand %p507_p6, %p501_p3 }
  0x11   :  { %511 = shalt.err (!%p508_p7)
}
  0x12   :  { %s609_s25 = smov 128   ;;  %s610_s26 = smov 8  }
  0x13   :  { %37 = dma.hbm_to_vmem [thread:$0]  %s716_s1, 2048, %s32_s16, [#allocation6], %s609_s25, %s609_s25, %s610_s26  }
  0x14   :  { %s611_s29 = smov [#allocation2]   ;;  %s512_s7 = scalar_lea.hbm %s715_s0, 128 }
  0x15   :  { %s19_s30 = sshll.u32 %s611_s29, 4  ;;  %p513_p8 = scmp.ne.s32.totalorder %s715_s0, %s512_s7  ;;  %s20_s30 = int_to_ptr.vmem [resolvable:$true] %s19_s30 }
  0x16   :  { %p516_p9 = scmp.lt.u32.totalorder %s512_s7, %s715_s0 }
  0x18   :  { %p518_p10 = pnand %p516_p9, %p513_p8 }
  0x1a   :  { %521 = shalt.err (!%p518_p10)
}
  0x1b   :  { %s522_s12 = scalar_lea.vmem %s20_s30, 128  ;;  %p527_p12 = scmp.lt.s32.totalorder %s20_s30, %s20_s30 }
  0x1c   :  { %p523_p11 = scmp.ne.s32.totalorder %s20_s30, %s522_s12  ;;  %p528_p13 = scmp.lt.s32.totalorder %s522_s12, %s522_s12 }
  0x1e   :  { %p529_p0 = por %p528_p13, %p527_p12 }
  0x20   :  { %p530_p1 = pnand %p529_p0, %p523_p11 }
  0x22   :  { %533 = shalt.err (!%p530_p1)
}
  0x23   :  { %s612_s1 = smov 64   ;;  %s613_s13 = smov 4  }
  0x24   :  { %25 = dma.hbm_to_vmem [thread:$0]  %s715_s0, 128, %s20_s30, [#allocation3], %s612_s1, %s612_s1, %s613_s13  }
  0x25   :  { %s614_s16 = smov [#allocation7]   ;;  %s534_s20 = scalar_lea.hbm %s717_s2, 4096 }
  0x26   :  { %s43_s17 = sshll.u32 %s614_s16, 4  ;;  %p535_p2 = scmp.ne.s32.totalorder %s717_s2, %s534_s20  ;;  %s44_s17 = int_to_ptr.vmem [resolvable:$true] %s43_s17 }
  0x27   :  { %p538_p3 = scmp.lt.u32.totalorder %s534_s20, %s717_s2 }
  0x29   :  { %p540_p4 = pnand %p538_p3, %p535_p2 }
  0x2b   :  { %543 = shalt.err (!%p540_p4)
}
  0x2c   :  { %s544_s27 = scalar_lea.vmem %s44_s17, 4096  ;;  %p549_p6 = scmp.lt.s32.totalorder %s44_s17, %s44_s17 }
  0x2d   :  { %p545_p5 = scmp.ne.s32.totalorder %s44_s17, %s544_s27  ;;  %p550_p7 = scmp.lt.s32.totalorder %s544_s27, %s544_s27 }
  0x2f   :  { %p551_p8 = por %p550_p7, %p549_p6 }
  0x31   :  { %p552_p9 = pnand %p551_p8, %p545_p5 }
  0x33   :  { %555 = shalt.err (!%p552_p9)
}
  0x34   :  { %49 = dma.hbm_to_vmem [thread:$0]  %s717_s2, 4096, %s44_s17, [#allocation6], %s609_s25, %s609_s25, %s610_s26  }
  0x35   :  { %600 = dma.done.wait [#allocation3], 128  }
  0x36   :  { %601 = vsyncadd [#allocation3], 4294967168 }
  0x37   :  { %602 = dma.done.wait [#allocation6], 6144  }
  0x38   :  { %603 = vsyncadd [#allocation6], 4294961152  ;;  %v615_v0 = vmov 0   ;;  %v465_v1 = vld [vmem:[#allocation5 + $0x4] ss:$8 sps:$4 sm:$0xff]   ;;  %v239_v16 = vld [vmem:[#allocation7 + $0x90] sm:$0xff] }
  0x39   :  { %196 = vmatprep.mubr.bf16.mxu0 %v615_v0  ;;  %v467_v2 = vld [vmem:[#allocation5] ss:$8 sps:$4 sm:$0xff]   ;;  %164 = vmatprep.subr.bf16.mxu0 %v465_v1  ;;  %v468_v3 = vld [vmem:[#allocation5 + $0x14] ss:$8 sps:$4 sm:$0xff]   ;;  %v470_v4 = vld [vmem:[#allocation5 + $0x10] ss:$8 sps:$4 sm:$0xff]  }
  0x3a   :  { %165 = vmatpush1.bf16.msra.mxu0 %v467_v2  ;;  %v471_v5 = vld [vmem:[#allocation5 + $0x24] ss:$8 sps:$4 sm:$0xff]   ;;  %v473_v6 = vld [vmem:[#allocation5 + $0x20] ss:$8 sps:$4 sm:$0xff]   ;;  %v474_v7 = vld [vmem:[#allocation5 + $0x34] ss:$8 sps:$4 sm:$0xff]  }
  0x3b   :  { %166 = vmatprep.subr.bf16.mxu0 %v468_v3  ;;  %v476_v8 = vld [vmem:[#allocation5 + $0x30] ss:$8 sps:$4 sm:$0xff]   ;;  %v477_v9 = vld [vmem:[#allocation5 + $0x44] ss:$8 sps:$4 sm:$0xff]   ;;  %v479_v23 = vld [vmem:[#allocation5 + $0x40] ss:$8 sps:$4 sm:$0xff]  }
  0x3c   :  { %v237_v10 = vld [vmem:[#allocation7 + $0x80] sm:$0xff]  ;;  %v238_v11 = vld [vmem:[#allocation7 + $0x88] sm:$0xff]  ;;  %v240_v17 = vld [vmem:[#allocation7 + $0x98] sm:$0xff]  ;;  %s616_s2 = smov [#allocation9]  }
  0x3d   :  { %v221_v12 = vld [vmem:[#allocation7] sm:$0xff]  ;;  %v222_v13 = vld [vmem:[#allocation7 + $0x8] sm:$0xff]  ;;  %v423_v14 = vpack.c.bf16 %v238_v11, %v237_v10  ;;  %v223_v18 = vld [vmem:[#allocation7 + $0x10] sm:$0xff]  ;;  %v427_v19 = vpack.c.bf16 %v240_v17, %v239_v16  ;;  %s347_s29 = sshll.u32 %s616_s2, 4  ;;  %s348_s29 = int_to_ptr.vmem [resolvable:$true] %s347_s29 }
  0x3e   :  { %167 = vmatpush1.bf16.msra.mxu0 %v470_v4  ;;  %v425_v15 = vpack.c.bf16 %v222_v13, %v221_v12  ;;  %v224_v20 = vld [vmem:[#allocation7 + $0x18] sm:$0xff]  ;;  %v241_v21 = vld [vmem:[#allocation7 + $0xa0] sm:$0xff]  ;;  %v242_v22 = vld [vmem:[#allocation7 + $0xa8] sm:$0xff]  ;;  %s556_s30 = scalar_lea.vmem %s348_s29, 256  ;;  %p561_p11 = scmp.lt.s32.totalorder %s348_s29, %s348_s29 }
  0x3f   :  { %168 = vmatprep.subr.bf16.mxu0 %v471_v5  ;;  %424 = vmatprep.subr.bf16.mxu1 %v423_v14  ;;  %v480_v24 = vld [vmem:[#allocation5 + $0x54] ss:$8 sps:$4 sm:$0xff]   ;;  %v429_v25 = vpack.c.bf16 %v224_v20, %v223_v18  ;;  %v431_v26 = vpack.c.bf16 %v242_v22, %v241_v21  ;;  %v225_v27 = vld [vmem:[#allocation7 + $0x20] sm:$0xff]  ;;  %v226_v28 = vld [vmem:[#allocation7 + $0x28] sm:$0xff]  ;;  %p557_p10 = scmp.ne.s32.totalorder %s348_s29, %s556_s30  ;;  %p562_p12 = scmp.lt.s32.totalorder %s556_s30, %s556_s30 }
  0x40   :  { %426 = vmatpush3.bf16.msra.mxu1 %v425_v15  ;;  %v243_v29 = vld [vmem:[#allocation7 + $0xb0] sm:$0xff]  ;;  %v244_v30 = vld [vmem:[#allocation7 + $0xb8] sm:$0xff]  ;;  %v483_v32 = vld [vmem:[#allocation5 + $0x64] ss:$8 sps:$4 sm:$0xff]   ;;  %v433_v33 = vpack.c.bf16 %v226_v28, %v225_v27 }
  0x41   :  { %428 = vmatprep.subr.bf16.mxu1 %v427_v19  ;;  %v482_v31 = vld [vmem:[#allocation5 + $0x50] ss:$8 sps:$4 sm:$0xff]   ;;  %v435_v34 = vpack.c.bf16 %v244_v30, %v243_v29  ;;  %v245_v37 = vld [vmem:[#allocation7 + $0xc0] sm:$0xff]  ;;  %v246_v38 = vld [vmem:[#allocation7 + $0xc8] sm:$0xff]  ;;  %p563_p13 = por %p562_p12, %p561_p11 }
  0x42   :  { %169 = vmatpush1.bf16.msra.mxu0 %v473_v6  ;;  %v227_v35 = vld [vmem:[#allocation7 + $0x30] sm:$0xff]  ;;  %v228_v36 = vld [vmem:[#allocation7 + $0x38] sm:$0xff]  ;;  %v485_v39 = vld [vmem:[#allocation5 + $0x60] ss:$8 sps:$4 sm:$0xff]   ;;  %v439_v42 = vpack.c.bf16 %v246_v38, %v245_v37 }
  0x43   :  { %170 = vmatprep.subr.bf16.mxu0 %v474_v7  ;;  %v486_v40 = vld [vmem:[#allocation5 + $0x74] ss:$8 sps:$4 sm:$0xff]   ;;  %v437_v41 = vpack.c.bf16 %v228_v36, %v227_v35  ;;  %v229_v43 = vld [vmem:[#allocation7 + $0x40] sm:$0xff]  ;;  %v230_v44 = vld [vmem:[#allocation7 + $0x48] sm:$0xff]  ;;  %p564_p0 = pnand %p563_p13, %p557_p10 }
  0x44   :  { %430 = vmatpush3.bf16.msra.mxu1 %v429_v25  ;;  %v247_v45 = vld [vmem:[#allocation7 + $0xd0] sm:$0xff]  ;;  %v248_v46 = vld [vmem:[#allocation7 + $0xd8] sm:$0xff]  ;;  %v441_v48 = vpack.c.bf16 %v230_v44, %v229_v43  ;;  %v249_v53 = vld [vmem:[#allocation7 + $0xe0] sm:$0xff] }
  0x45   :  { %432 = vmatprep.subr.bf16.mxu1 %v431_v26  ;;  %v488_v47 = vld [vmem:[#allocation5 + $0x70] ss:$8 sps:$4 sm:$0xff]   ;;  %v443_v49 = vpack.c.bf16 %v248_v46, %v247_v45  ;;  %v250_v54 = vld [vmem:[#allocation7 + $0xe8] sm:$0xff]  ;;  %v233_v57 = vld [vmem:[#allocation7 + $0x60] sm:$0xff] }
  0x46   :  { %171 = vmatpush1.bf16.msra.mxu0 %v476_v8  ;;  %v231_v50 = vld [vmem:[#allocation7 + $0x50] sm:$0xff]  ;;  %v232_v51 = vld [vmem:[#allocation7 + $0x58] sm:$0xff]  ;;  %v447_v56 = vpack.c.bf16 %v250_v54, %v249_v53  ;;  %v234_v58 = vld [vmem:[#allocation7 + $0x68] sm:$0xff] }
  0x47   :  { %172 = vmatprep.subr.bf16.mxu0 %v477_v9  ;;  %v489_v52 = vld [vmem:[#allocation2] sm:$0xff]   ;;  %v445_v55 = vpack.c.bf16 %v232_v51, %v231_v50  ;;  %v251_v59 = vld [vmem:[#allocation7 + $0xf0] sm:$0xff]  ;;  %v449_v61 = vpack.c.bf16 %v234_v58, %v233_v57 }
  0x48   :  { %434 = vmatpush3.bf16.msra.mxu1 %v433_v33  ;;  %v252_v60 = vld [vmem:[#allocation7 + $0xf8] sm:$0xff]  ;;  %v235_v63 = vld [vmem:[#allocation7 + $0x70] sm:$0xff] }
  0x49   :  { %436 = vmatprep.subr.bf16.mxu1 %v435_v34  ;;  %v451_v62 = vpack.c.bf16 %v252_v60, %v251_v59  ;;  %v236_v0 = vld [vmem:[#allocation7 + $0x78] sm:$0xff] }
  0x4a   :  { %173 = vmatpush1.bf16.msra.mxu0 %v479_v23  ;;  %v453_v1 = vpack.c.bf16 %v236_v0, %v235_v63 }
  0x4b   :  { %174 = vmatprep.subr.bf16.mxu0 %v480_v24 }
  0x4c   :  { %438 = vmatpush3.bf16.msra.mxu1 %v437_v41 }
  0x4d   :  { %440 = vmatprep.subr.bf16.mxu1 %v439_v42 }
  0x4e   :  { %175 = vmatpush1.bf16.msra.mxu0 %v482_v31 }
  0x4f   :  { %176 = vmatprep.subr.bf16.mxu0 %v483_v32 }
  0x50   :  { %442 = vmatpush3.bf16.msra.mxu1 %v441_v48 }
  0x51   :  { %444 = vmatprep.subr.bf16.mxu1 %v443_v49 }
  0x52   :  { %177 = vmatpush1.bf16.msra.mxu0 %v485_v39 }
  0x53   :  { %178 = vmatprep.subr.bf16.mxu0 %v486_v40 }
  0x54   :  { %446 = vmatpush3.bf16.msra.mxu1 %v445_v55 }
  0x55   :  { %448 = vmatprep.subr.bf16.mxu1 %v447_v56 }
  0x56   :  { %179 = vmatpush1.bf16.msra.mxu0 %v488_v47 }
  0x58   :  { %450 = vmatpush3.bf16.msra.mxu1 %v449_v61 }
  0x59   :  { %197 = vmatmul.mubr.bf16.vlgmr.msra.gmra.mrb[0].mxu0 %v489_v52  ;;  %452 = vmatprep.subr.bf16.mxu1 %v451_v62 }
  0x5c   :  { %454 = vmatpush3.bf16.msra.mxu1 %v453_v1 }
 0x12c   :  { %v198_v2 = vpop.f32.mrb[0].mxu0 }
 0x12d   :  { %v200_v3 = vpop.f32.mrb[1].mxu0 }
 0x12e   :  { %v383_v4 = vpack.c.bf16 %v200_v3, %v198_v2  ;;  %v202_v5 = vpop.f32.mrb[2].mxu0  ;;  %317 = vmatprep.mubr.f32.mxu1 %v200_v3 }
 0x12f   :  { %v204_v6 = vpop.f32.mrb[3].mxu0  ;;  %318 = vmatmul.mubr.f32.vlgmr.msra.gmra.mrb[0].mxu1 %v198_v2 }
 0x130   :  { %219 = vst [vmem:[#allocation9] sm:$0xff] %v383_v4  ;;  %v384_v7 = vpack.c.bf16 %v204_v6, %v202_v5  ;;  %322 = vmatprep.mubr.f32.mxu1 %v204_v6 }
 0x132   :  { %220 = vst [vmem:[#allocation9 + $0x8] sm:$0xff] %v384_v7 }
 0x133   :  { %323 = vmatmul.mubr.f32.gmra.mrb[2].mxu1 %v202_v5 }
 0x134   :  { %567 = shalt.err (!%p564_p0)
}
 0x135   :  { %s568_s7 = scalar_lea.hbm %s719_s4, 256 }
 0x136   :  { %p569_p1 = scmp.ne.s32.totalorder %s719_s4, %s568_s7  ;;  %p572_p2 = scmp.lt.u32.totalorder %s568_s7, %s719_s4 }
 0x138   :  { %p574_p3 = pnand %p572_p2, %p569_p1 }
 0x13a   :  { %577 = shalt.err (!%p574_p3)
}
 0x13b   :  { %353 = dma.vmem_to_hbm [thread:$0]  %s348_s29, 256, %s719_s4, [#allocation10], %s609_s25, %s609_s25, %s610_s26  }
 0x13c   :  { %s617_s13 = smov [#allocation8]  }
 0x13d   :  { %s335_s14 = sshll.u32 %s617_s13, 4  ;;  %s336_s14 = int_to_ptr.vmem [resolvable:$true] %s335_s14 }
 0x13e   :  { %s578_s15 = scalar_lea.vmem %s336_s14, 256  ;;  %p583_p5 = scmp.lt.s32.totalorder %s336_s14, %s336_s14 }
 0x13f   :  { %p579_p4 = scmp.ne.s32.totalorder %s336_s14, %s578_s15  ;;  %p584_p6 = scmp.lt.s32.totalorder %s578_s15, %s578_s15 }
 0x141   :  { %p585_p7 = por %p584_p6, %p583_p5 }
 0x143   :  { %p586_p8 = pnand %p585_p7, %p579_p4 }
 0x202   :  { %v417_v8 = vpop.f32.mrb[0].mxu1 }
 0x203   :  { %v418_v9 = vpop.f32.mrb[1].mxu1 }
 0x204   :  { %v419_v10 = vadd.f32 %v418_v9, %v417_v8 }
 0x206   :  { %328 = vst [vmem:[#allocation8] sm:$0xff] %v419_v10  ;;  %v420_v11 = vpop.f32.mrb[2].mxu1 }
 0x207   :  { %v421_v12 = vpop.f32.mrb[3].mxu1 }
 0x208   :  { %v422_v13 = vadd.f32 %v421_v12, %v420_v11 }
 0x20a   :  { %329 = vst [vmem:[#allocation8 + $0x8] sm:$0xff] %v422_v13 }
 0x20b   :  { %589 = shalt.err (!%p586_p8)
}
 0x20c   :  { %s590_s17 = scalar_lea.hbm %s718_s3, 256 }
 0x20d   :  { %p591_p9 = scmp.ne.s32.totalorder %s718_s3, %s590_s17  ;;  %p594_p10 = scmp.lt.u32.totalorder %s590_s17, %s718_s3 }
 0x20f   :  { %p596_p11 = pnand %p594_p10, %p591_p9 }
 0x211   :  { %599 = shalt.err (!%p596_p11)
}
 0x212   :  { %341 = dma.vmem_to_hbm [thread:$0]  %s336_s14, 256, %s718_s3, [#allocation4], %s609_s25, %s609_s25, %s610_s26  }
 0x213   :  { %604 = dma.done.wait [#allocation4], 256  }
 0x214   :  { %605 = vsyncadd [#allocation4], 4294967040 }
 0x215   :  { %606 = dma.done.wait [#allocation10], 256  }
 0x216   :  { %607 = vsyncadd [#allocation10], 4294967040 }
 0x217   :  { %360 = vsyncpa [#allocation3], 1 }
 0x218   :  { %361 = vsyncpa [#allocation6], 1 }
 0x219   :  { %362 = vsyncpa [#allocation4], 1 }
 0x21a   :  { %363 = vsyncpa [#allocation10], 1 }

</bundles_post_ra>
